<compile_context>
chip_gen: v7x
topology: tpu7x:2x2x1
jax: 0.10.0
libtpu: 0.0.40
codegen_flags: <defaults>
</compile_context>

<pallas_src>
import jax
import jax.numpy as jnp
from jax import lax
from jax.experimental import pallas as pl
from jax.experimental.pallas import tpu as pltpu

OUTPUT_DIM = 1                 # stand-in for cfg.MODEL.OUTPUT_DIM
LANE = 128                     # lane-padded feature width
COUNT_LANE = LANE - 1          # zero-padded lane of final edge features carrying the 1.0 count marker


def _round_up(x, m):
    return (x + m - 1) // m * m


def _vmem_limit_bytes():
    # ~3/4 of physical VMEM, capped at ~100 MiB (v5e/v6e: ~96 MiB, v7x: ~48 MiB).
    try:
        cap = int(pltpu.get_tpu_info().vmem_capacity_bytes)
        return min(100 * 1024 * 1024, cap * 3 // 4)
    except Exception:
        return 64 * 1024 * 1024


VMEM_LIMIT = _vmem_limit_bytes()


def _pick_row_tile(m):
    for t in (1024, 512, 256, 128):
        if m % t == 0:
            return t
    return m


# --------------------------- encoder linear kernel -------------------------- #

def _encoder_kernel(x_ref, w_ref, b_ref, o_ref):
    # Tiny-K (<= 8) linear as K broadcast-FMAs on the VPU: avoids a wasted 128-deep
    # MXU pass and only DMAs K input lanes instead of 128 zero-padded f32 lanes.
    x = x_ref[...]                                    # (rt, K) f32
    acc = x[:, 0:1] * w_ref[0:1, :]                   # (rt, 128) f32
    for k in range(1, x.shape[1]):
        acc += x[:, k:k + 1] * w_ref[k:k + 1, :]
    o_ref[...] = jnp.maximum(acc + b_ref[...], 0.0).astype(o_ref.dtype)


def _encoder_linear(x, w_f32, b_f32):
    """y = relu(x @ w + b) -> bf16, row-tiled over a 'parallel' grid."""
    M, K = x.shape
    D = w_f32.shape[1]
    rt = _pick_row_tile(M)
    return pl.pallas_call(
        _encoder_kernel,
        out_shape=jax.ShapeDtypeStruct((M, D), jnp.bfloat16),
        grid=(M // rt,),
        in_specs=[
            pl.BlockSpec((rt, K), lambda i: (i, 0)),
            pl.BlockSpec((K, D), lambda i: (0, 0)),
            pl.BlockSpec((1, D), lambda i: (0, 0)),
        ],
        out_specs=pl.BlockSpec((rt, D), lambda i: (i, 0)),
        compiler_params=pltpu.CompilerParams(
            dimension_semantics=("parallel",),
            vmem_limit_bytes=VMEM_LIMIT),
    )(x, w_f32, b_f32)


# --------------------------- fused EdgeMPNN layer --------------------------- #

def _mpnn_layer_kernel(dst_ref, he_ref, h_ref,
                       wmsg_ref, bm_ref, we_ref, be_ref,
                       wnh_ref, wna_ref, bn_ref,
                       e_out_ref, h_out_ref, agg_ref):
    """One EdgeMPNN layer over one edge-row tile.

    Grid axis = edge tiles ("arbitrary": the node aggregation reduces over it).
    agg_ref (N_pad, 128) f32 VMEM scratch accumulates the message segment-sum.
    """
    t = pl.program_id(0)

    @pl.when(t == 0)
    def _():
        agg_ref[...] = jnp.zeros_like(agg_ref)

    # Message MLP: one K=384 matmul over the pre-gathered [h_src | h_dst | e] rows.
    m = jnp.dot(he_ref[...], wmsg_ref[...], preferred_element_type=jnp.float32)
    m = jnp.maximum(m + bm_ref[...], 0.0)                       # (TE, H) f32
    m_bf = m.astype(jnp.bfloat16)

    # Edge update.
    e_new = jnp.dot(m_bf, we_ref[...], preferred_element_type=jnp.float32) + be_ref[...]
    e_out_ref[...] = jnp.maximum(e_new, 0.0).astype(e_out_ref.dtype)

    # Scatter-add of messages into destination nodes: one-hot built ALREADY
    # transposed (sublane iota vs lane-major dst row) -> straight MXU matmul into
    # the VMEM accumulator.  Padded edges have dst == -1 -> all-zero column.
    npad = agg_ref.shape[0]
    te = he_ref.shape[0]
    iota_n = lax.broadcasted_iota(jnp.int32, (npad, te), 0)
    oh_dst_t = (dst_ref[...] == iota_n).astype(jnp.bfloat16)     # (N_pad, TE)
    agg_ref[...] += jnp.dot(oh_dst_t, m_bf, preferred_element_type=jnp.float32)

    # Node update once all edge tiles have been aggregated.
    @pl.when(t == pl.num_programs(0) - 1)
    def _():
        h_new = (jnp.dot(h_ref[...], wnh_ref[...], preferred_element_type=jnp.float32)
                 + jnp.dot(agg_ref[...].astype(jnp.bfloat16), wna_ref[...],
                           preferred_element_type=jnp.float32)
                 + bn_ref[...])
        h_out_ref[...] = jnp.maximum(h_new, 0.0).astype(h_out_ref.dtype)


def _mpnn_layer(lp, dst_row, he, h, *, edge_tile):
    E_pad = he.shape[0]
    N_pad = h.shape[0]
    row = lambda t: (t, 0)
    full = lambda t: (0, 0)
    e_new, h_new = pl.pallas_call(
        _mpnn_layer_kernel,
        out_shape=(jax.ShapeDtypeStruct((E_pad, LANE), jnp.bfloat16),
                   jax.ShapeDtypeStruct((N_pad, LANE), jnp.bfloat16)),
        grid=(E_pad // edge_tile,),
        in_specs=[
            pl.BlockSpec((1, edge_tile), lambda t: (0, t)),      # dst ids (lane-major)
            pl.BlockSpec((edge_tile, 3 * LANE), row),            # [h_src | h_dst | e]
            pl.BlockSpec((N_pad, LANE), full),                   # h (bf16, resident)
            pl.BlockSpec((3 * LANE, LANE), full),                # stacked W_msg
            pl.BlockSpec((1, LANE), full),                       # bm
            pl.BlockSpec((LANE, LANE), full),                    # we
            pl.BlockSpec((1, LANE), full),                       # be
            pl.BlockSpec((LANE, LANE), full),                    # wn_h
            pl.BlockSpec((LANE, LANE), full),                    # wn_agg
            pl.BlockSpec((1, LANE), full),                       # bn
        ],
        out_specs=(pl.BlockSpec((edge_tile, LANE), row),
                   pl.BlockSpec((N_pad, LANE), full)),
        scratch_shapes=[pltpu.VMEM((N_pad, LANE), jnp.float32)],
        compiler_params=pltpu.CompilerParams(
            dimension_semantics=("arbitrary",),                  # reduction over edge tiles
            vmem_limit_bytes=VMEM_LIMIT),
    )(dst_row, he, h,
      lp["w_msg"], lp["bm"], lp["we"], lp["be"],
      lp["wn_h"], lp["wn_agg"], lp["bn"])
    return h_new, e_new


# ----------------------- fused edge readout (mean + MLP) -------------------- #

def _readout_kernel(gid_ref, e_ref, w1_ref, b1_ref, w2_ref, b2_ref,
                    out_ref, pooled_ref):
    t = pl.program_id(0)

    @pl.when(t == 0)
    def _():
        pooled_ref[...] = jnp.zeros_like(pooled_ref)

    gpad = pooled_ref.shape[0]
    te = e_ref.shape[0]
    iota_g = lax.broadcasted_iota(jnp.int32, (gpad, te), 0)
    oh_g_t = (gid_ref[...] == iota_g).astype(jnp.bfloat16)       # (G_pad, TE)
    # One matmul produces BOTH the pooled edge features and (via the 1.0 marker in
    # COUNT_LANE of every real edge row) the per-graph edge counts.
    pooled_ref[...] += jnp.dot(oh_g_t, e_ref[...], preferred_element_type=jnp.float32)

    @pl.when(t == pl.num_programs(0) - 1)
    def _():
        pooled = pooled_ref[...]
        cnt = pooled[:, COUNT_LANE:COUNT_LANE + 1]               # (G_pad, 1)
        inv = pl.reciprocal(jnp.maximum(cnt, 1.0), approx=False)  # exact mean
        mean = (pooled * inv).astype(jnp.bfloat16)
        hdn = jnp.maximum(
            jnp.dot(mean, w1_ref[...], preferred_element_type=jnp.float32)
            + b1_ref[...], 0.0)
        out_ref[...] = (jnp.dot(hdn.astype(jnp.bfloat16), w2_ref[...],
                                preferred_element_type=jnp.float32) + b2_ref[...])


def _edge_readout(params, gid_row, e_marked, g_pad, *, edge_tile):
    E_pad = e_marked.shape[0]
    row = lambda t: (t, 0)
    full = lambda t: (0, 0)
    return pl.pallas_call(
        _readout_kernel,
        out_shape=jax.ShapeDtypeStruct((g_pad, LANE), jnp.float32),
        grid=(E_pad // edge_tile,),
        in_specs=[
            pl.BlockSpec((1, edge_tile), lambda t: (0, t)),      # edge -> graph id
            pl.BlockSpec((edge_tile, LANE), row),                # final edge features
            pl.BlockSpec((LANE, LANE), full),                    # ro_w1
            pl.BlockSpec((1, LANE), full),                       # ro_b1
            pl.BlockSpec((LANE, LANE), full),                    # ro_w2
            pl.BlockSpec((1, LANE), full),                       # ro_b2
        ],
        out_specs=pl.BlockSpec((g_pad, LANE), full),
        scratch_shapes=[pltpu.VMEM((g_pad, LANE), jnp.float32)],
        compiler_params=pltpu.CompilerParams(
            dimension_semantics=("arbitrary",),
            vmem_limit_bytes=VMEM_LIMIT),
    )(gid_row, e_marked, params["ro_w1"], params["ro_b1"],
      params["ro_w2"], params["ro_b2"])


# ------------------------------- parameters --------------------------------- #

def _glorot(key, shape):
    fan_in, fan_out = shape
    scale = jnp.sqrt(2.0 / (fan_in + fan_out)).astype(jnp.float32)
    return scale * jax.random.normal(key, shape, dtype=jnp.float32)


def _pad_w(w, rows=LANE, cols=LANE, dtype=jnp.bfloat16):
    out = jnp.zeros((rows, cols), jnp.float32).at[:w.shape[0], :w.shape[1]].set(w)
    return out.astype(dtype)


def _pad_b(b):
    return jnp.zeros((1, LANE), jnp.float32).at[0, :b.shape[0]].set(b)


def init_params(key, node_in_dim, edge_in_dim):
    ks = iter(jax.random.split(key, 64))
    p = {}
    k_node = _round_up(max(node_in_dim, 1), 8)
    k_edge = _round_up(max(edge_in_dim, 1), 8)
    # NodeEdgeFeatEncoder(64): Linear + ReLU for node and edge features (f32 VPU path).
    p["enc_node_w"] = _pad_w(_glorot(next(ks), (node_in_dim, 64)), rows=k_node, dtype=jnp.float32)
    p["enc_node_b"] = _pad_b(jnp.zeros((64,), jnp.float32))
    p["enc_edge_w"] = _pad_w(_glorot(next(ks), (edge_in_dim, 64)), rows=k_edge, dtype=jnp.float32)
    p["enc_edge_b"] = _pad_b(jnp.zeros((64,), jnp.float32))
    # EdgeMPNN(node_in=64, edge_in=64, hidden=76, node_out=20, edge_out=20, depth=3)
    node_dims = [64, 64, 64, 20]
    edge_dims = [64, 64, 64, 20]
    hidden = 76
    layers = []
    for l in range(3):
        nd_in, nd_out = node_dims[l], node_dims[l + 1]
        ed_in, ed_out = edge_dims[l], edge_dims[l + 1]
        wm_src = _pad_w(_glorot(next(ks), (nd_in, hidden)))
        wm_dst = _pad_w(_glorot(next(ks), (nd_in, hidden)))
        wm_e = _pad_w(_glorot(next(ks), (ed_in, hidden)))
        layers.append({
            # K=384 stacked message weight: m = relu([h_src | h_dst | e] @ w_msg + bm)
            "w_msg": jnp.concatenate([wm_src, wm_dst, wm_e], axis=0),
            "bm": _pad_b(jnp.zeros((hidden,), jnp.float32)),
            "we": _pad_w(_glorot(next(ks), (hidden, ed_out))),
            "be": _pad_b(jnp.zeros((ed_out,), jnp.float32)),
            "wn_h": _pad_w(_glorot(next(ks), (nd_in, nd_out))),
            "wn_agg": _pad_w(_glorot(next(ks), (hidden, nd_out))),
            "bn": _pad_b(jnp.zeros((nd_out,), jnp.float32)),
        })
    p["mpnn"] = layers
    # MLPEdgeReadout(20, 10, OUTPUT_DIM)
    p["ro_w1"] = _pad_w(_glorot(next(ks), (20, 10)))
    p["ro_b1"] = _pad_b(jnp.zeros((10,), jnp.float32))
    p["ro_w2"] = _pad_w(_glorot(next(ks), (10, OUTPUT_DIM)))
    p["ro_b2"] = _pad_b(jnp.zeros((OUTPUT_DIM,), jnp.float32))
    return p


# ------------------------------ forward pass -------------------------------- #

def model_encoder_forward(params, x, edge_index, edge_attr, batch_vec, num_graphs,
                          *, edge_tile=128):
    """Equivalent of ModelEncoder.forward(batch) -> (num_graphs, OUTPUT_DIM)."""
    N = x.shape[0]
    E = edge_attr.shape[0]
    src = edge_index[0].astype(jnp.int32)
    dst = edge_index[1].astype(jnp.int32)

    N_pad = _round_up(max(N, 1), LANE)
    G_pad = _round_up(max(num_graphs, 1), 8)
    edge_tile = max(LANE, _round_up(edge_tile, LANE))   # lane-major dst row needs 128-multiples
    E_pad = _round_up(max(E, 1), edge_tile)

    k_node = params["enc_node_w"].shape[0]
    k_edge = params["enc_edge_w"].shape[0]

    # Narrow (K-only) zero padding of the raw features — no 128-lane f32 blow-up.
    x_pad = jnp.zeros((N_pad, k_node), jnp.float32).at[:N, :x.shape[1]].set(x)
    ea_pad = jnp.zeros((E_pad, k_edge), jnp.float32).at[:E, :edge_attr.shape[1]].set(edge_attr)

    # Edge index plumbing:
    #  * gather indices clipped to node 0 for padded edges (keeps everything finite),
    #  * scatter / pooling indices keep -1 for padded edges -> zero one-hot column,
    #    so padded edges never contribute to aggregation or pooling.
    src_g = jnp.zeros((E_pad,), jnp.int32).at[:E].set(src)
    dst_g = jnp.zeros((E_pad,), jnp.int32).at[:E].set(dst)
    dst_row = jnp.full((1, E_pad), -1, jnp.int32).at[0, :E].set(dst)
    gid_row = jnp.full((1, E_pad), -1, jnp.int32).at[0, :E].set(
        batch_vec.astype(jnp.int32)[src])
    valid_edge = jnp.zeros((E_pad,), jnp.bfloat16).at[:E].set(1.0)

    # --- NodeEdgeFeatEncoder: Linear + ReLU to 64-d (lane-padded to 128, bf16) ---
    h = _encoder_linear(x_pad, params["enc_node_w"], params["enc_node_b"])    # (N_pad, 128) bf16
    e = _encoder_linear(ea_pad, params["enc_edge_w"], params["enc_edge_b"])   # (E_pad, 128) bf16

    # --- EdgeMPNN: 3 fused layers (one pallas_call each) ---
    # h[src]/h[dst] gather + concat are O(E*D) XLA ops between layers; the dense
    # O(E*N*D) in-kernel one-hot gather is gone.  The dst scatter stays fused as an
    # MXU one-hot accumulate into VMEM scratch.
    for lp in params["mpnn"]:
        he = jnp.concatenate([h[src_g], h[dst_g], e], axis=1)     # (E_pad, 384) bf16
        h, e = _mpnn_layer(lp, dst_row, he, h, edge_tile=edge_tile)

    # --- GNNwEdgeReadout / MLPEdgeReadout: fused mean-pool + MLP ---
    # Edge counts ride in the zero-padded COUNT_LANE (1.0 per real edge).
    e_marked = e.at[:, COUNT_LANE].set(valid_edge)
    out = _edge_readout(params, gid_row, e_marked, G_pad, edge_tile=edge_tile)
    return out[:num_graphs, :OUTPUT_DIM]


# ---------------------------------- main ------------------------------------ #

if __name__ == "__main__":
    key = jax.random.PRNGKey(0)
    k_x, k_e, k_src, k_dst, k_p = jax.random.split(key, 5)

    num_graphs = 2
    nodes_per_graph = 8
    edges_per_graph = 80          # E = 160 -> E_pad = 256 -> 2 edge tiles (multi-step accumulator)
    N = num_graphs * nodes_per_graph
    E = num_graphs * edges_per_graph
    node_in_dim = 1               # ModelEncoder(input_dim=1)
    edge_in_dim = 4

    x = jax.random.normal(k_x, (N, node_in_dim), dtype=jnp.float32)
    edge_attr = jax.random.normal(k_e, (E, edge_in_dim), dtype=jnp.float32)

    # Deterministic random intra-graph connectivity + batch assignment vector.
    src_local = jax.random.randint(k_src, (num_graphs, edges_per_graph), 0, nodes_per_graph)
    dst_local = jax.random.randint(k_dst, (num_graphs, edges_per_graph), 0, nodes_per_graph)
    offsets = (jnp.arange(num_graphs, dtype=jnp.int32) * nodes_per_graph)[:, None]
    edge_index = jnp.stack([(src_local + offsets).reshape(-1),
                            (dst_local + offsets).reshape(-1)]).astype(jnp.int32)   # (2, E)
    batch_vec = jnp.repeat(jnp.arange(num_graphs, dtype=jnp.int32), nodes_per_graph)  # (N,)

    params = init_params(k_p, node_in_dim, edge_in_dim)
    out = model_encoder_forward(params, x, edge_index, edge_attr, batch_vec,
                                num_graphs, edge_tile=128)
    out = jax.block_until_ready(out)
    assert out.shape == (num_graphs, OUTPUT_DIM)
    assert bool(jnp.all(jnp.isfinite(out)))
    print("KERNEL_OK")
</pallas_src>

<mosaic_0001>
module attributes {stable_mosaic.version = 11 : i64} {
  func.func @_encoder_kernel(%arg0: i32, %arg1: memref<128x8xf32, #tpu.memory_space<vmem>>, %arg2: memref<8x128xf32, #tpu.memory_space<vmem>>, %arg3: memref<1x128xf32, #tpu.memory_space<vmem>>, %arg4: memref<128x128xbf16, #tpu.memory_space<vmem>>) attributes {dimension_semantics = [#tpu.dimension_semantics<parallel>], iteration_bounds = array<i64: 1>, scalar_prefetch = 0 : i64, scratch_operands = 0 : i64, tpu.core_type = #tpu.core_type<tc>, window_params = [{transform_indices = @transform_0, window_bounds = array<i64: 128, 8>}, {pipeline_mode = #tpu.pipeline_mode<synchronous>, transform_indices = @transform_1, window_bounds = array<i64: 8, 128>}, {pipeline_mode = #tpu.pipeline_mode<synchronous>, transform_indices = @transform_2, window_bounds = array<i64: 1, 128>}, {transform_indices = @transform_3, window_bounds = array<i64: 128, 128>}]} {
    %c0 = arith.constant 0 : index
    %c0_0 = arith.constant 0 : index
    %0 = vector.load %arg1[%c0, %c0_0] : memref<128x8xf32, #tpu.memory_space<vmem>>, vector<128x8xf32>
    %1 = vector.extract_strided_slice %0 {offsets = [0, 0], sizes = [128, 1], strides = [1, 1]} : vector<128x8xf32> to vector<128x1xf32>
    %c0_1 = arith.constant 0 : index
    %c0_2 = arith.constant 0 : index
    %2 = vector.load %arg2[%c0_1, %c0_2] : memref<8x128xf32, #tpu.memory_space<vmem>>, vector<1x128xf32>
    %3 = vector.broadcast %1 : vector<128x1xf32> to vector<128x128xf32>
    %4 = vector.broadcast %2 : vector<1x128xf32> to vector<128x128xf32>
    %5 = arith.mulf %3, %4 : vector<128x128xf32>
    %6 = vector.extract_strided_slice %0 {offsets = [0, 1], sizes = [128, 1], strides = [1, 1]} : vector<128x8xf32> to vector<128x1xf32>
    %c1 = arith.constant 1 : index
    %c0_3 = arith.constant 0 : index
    %7 = vector.load %arg2[%c1, %c0_3] : memref<8x128xf32, #tpu.memory_space<vmem>>, vector<1x128xf32>
    %8 = vector.broadcast %6 : vector<128x1xf32> to vector<128x128xf32>
    %9 = vector.broadcast %7 : vector<1x128xf32> to vector<128x128xf32>
    %10 = arith.mulf %8, %9 : vector<128x128xf32>
    %11 = arith.addf %5, %10 : vector<128x128xf32>
    %12 = vector.extract_strided_slice %0 {offsets = [0, 2], sizes = [128, 1], strides = [1, 1]} : vector<128x8xf32> to vector<128x1xf32>
    %c2 = arith.constant 2 : index
    %c0_4 = arith.constant 0 : index
    %13 = vector.load %arg2[%c2, %c0_4] : memref<8x128xf32, #tpu.memory_space<vmem>>, vector<1x128xf32>
    %14 = vector.broadcast %12 : vector<128x1xf32> to vector<128x128xf32>
    %15 = vector.broadcast %13 : vector<1x128xf32> to vector<128x128xf32>
    %16 = arith.mulf %14, %15 : vector<128x128xf32>
    %17 = arith.addf %11, %16 : vector<128x128xf32>
    %18 = vector.extract_strided_slice %0 {offsets = [0, 3], sizes = [128, 1], strides = [1, 1]} : vector<128x8xf32> to vector<128x1xf32>
    %c3 = arith.constant 3 : index
    %c0_5 = arith.constant 0 : index
    %19 = vector.load %arg2[%c3, %c0_5] : memref<8x128xf32, #tpu.memory_space<vmem>>, vector<1x128xf32>
    %20 = vector.broadcast %18 : vector<128x1xf32> to vector<128x128xf32>
    %21 = vector.broadcast %19 : vector<1x128xf32> to vector<128x128xf32>
    %22 = arith.mulf %20, %21 : vector<128x128xf32>
    %23 = arith.addf %17, %22 : vector<128x128xf32>
    %24 = vector.extract_strided_slice %0 {offsets = [0, 4], sizes = [128, 1], strides = [1, 1]} : vector<128x8xf32> to vector<128x1xf32>
    %c4 = arith.constant 4 : index
    %c0_6 = arith.constant 0 : index
    %25 = vector.load %arg2[%c4, %c0_6] : memref<8x128xf32, #tpu.memory_space<vmem>>, vector<1x128xf32>
    %26 = vector.broadcast %24 : vector<128x1xf32> to vector<128x128xf32>
    %27 = vector.broadcast %25 : vector<1x128xf32> to vector<128x128xf32>
    %28 = arith.mulf %26, %27 : vector<128x128xf32>
    %29 = arith.addf %23, %28 : vector<128x128xf32>
    %30 = vector.extract_strided_slice %0 {offsets = [0, 5], sizes = [128, 1], strides = [1, 1]} : vector<128x8xf32> to vector<128x1xf32>
    %c5 = arith.constant 5 : index
    %c0_7 = arith.constant 0 : index
    %31 = vector.load %arg2[%c5, %c0_7] : memref<8x128xf32, #tpu.memory_space<vmem>>, vector<1x128xf32>
    %32 = vector.broadcast %30 : vector<128x1xf32> to vector<128x128xf32>
    %33 = vector.broadcast %31 : vector<1x128xf32> to vector<128x128xf32>
    %34 = arith.mulf %32, %33 : vector<128x128xf32>
    %35 = arith.addf %29, %34 : vector<128x128xf32>
    %36 = vector.extract_strided_slice %0 {offsets = [0, 6], sizes = [128, 1], strides = [1, 1]} : vector<128x8xf32> to vector<128x1xf32>
    %c6 = arith.constant 6 : index
    %c0_8 = arith.constant 0 : index
    %37 = vector.load %arg2[%c6, %c0_8] : memref<8x128xf32, #tpu.memory_space<vmem>>, vector<1x128xf32>
    %38 = vector.broadcast %36 : vector<128x1xf32> to vector<128x128xf32>
    %39 = vector.broadcast %37 : vector<1x128xf32> to vector<128x128xf32>
    %40 = arith.mulf %38, %39 : vector<128x128xf32>
    %41 = arith.addf %35, %40 : vector<128x128xf32>
    %42 = vector.extract_strided_slice %0 {offsets = [0, 7], sizes = [128, 1], strides = [1, 1]} : vector<128x8xf32> to vector<128x1xf32>
    %c7 = arith.constant 7 : index
    %c0_9 = arith.constant 0 : index
    %43 = vector.load %arg2[%c7, %c0_9] : memref<8x128xf32, #tpu.memory_space<vmem>>, vector<1x128xf32>
    %44 = vector.broadcast %42 : vector<128x1xf32> to vector<128x128xf32>
    %45 = vector.broadcast %43 : vector<1x128xf32> to vector<128x128xf32>
    %46 = arith.mulf %44, %45 : vector<128x128xf32>
    %47 = arith.addf %41, %46 : vector<128x128xf32>
    %c0_10 = arith.constant 0 : index
    %c0_11 = arith.constant 0 : index
    %48 = vector.load %arg3[%c0_10, %c0_11] : memref<1x128xf32, #tpu.memory_space<vmem>>, vector<1x128xf32>
    %49 = vector.broadcast %48 : vector<1x128xf32> to vector<128x128xf32>
    %50 = arith.addf %47, %49 : vector<128x128xf32>
    %cst = arith.constant 0.000000e+00 : f32
    %51 = vector.broadcast %cst : f32 to vector<128x128xf32>
    %52 = arith.maximumf %50, %51 : vector<128x128xf32>
    %53 = arith.truncf %52 : vector<128x128xf32> to vector<128x128xbf16>
    %c0_12 = arith.constant 0 : index
    %c0_13 = arith.constant 0 : index
    %54 = vector.load %arg4[%c0_12, %c0_13] : memref<128x128xbf16, #tpu.memory_space<vmem>>, vector<128x128xbf16>
    tpu.vector_store %arg4[%c0_12, %c0_13], %53 {strides = array<i32>} : memref<128x128xbf16, #tpu.memory_space<vmem>>, vector<128x128xbf16>,
    return
  }
  func.func @transform_0(%arg0: i32) -> (i32, i32) {
    %c0_i32 = arith.constant 0 : i32
    %c0_i32_0 = arith.constant 0 : i32
    return %arg0, %c0_i32 : i32, i32
  }
  func.func @transform_1(%arg0: i32) -> (i32, i32) {
    %c0_i32 = arith.constant 0 : i32
    %c0_i32_0 = arith.constant 0 : i32
    %c0_i32_1 = arith.constant 0 : i32
    return %c0_i32, %c0_i32_0 : i32, i32
  }
  func.func @transform_2(%arg0: i32) -> (i32, i32) {
    %c0_i32 = arith.constant 0 : i32
    %c0_i32_0 = arith.constant 0 : i32
    %c0_i32_1 = arith.constant 0 : i32
    return %c0_i32, %c0_i32_0 : i32, i32
  }
  func.func @transform_3(%arg0: i32) -> (i32, i32) {
    %c0_i32 = arith.constant 0 : i32
    %c0_i32_0 = arith.constant 0 : i32
    return %arg0, %c0_i32 : i32, i32
  }
}

</mosaic_0001>

<bundles_post_ra>
// kernel: tpu_custom_call.1
= control target key start
LH: loop header
LB: loop body
LE: loop exit
PB: predicated region body
PF: predicated region fallthrough
CT: control target
= control target key end

     0   :  { %8 = vsyncpa [#allocation3], 0  ;;  %s1897_s0 = inlined_call_operand.hbm [shape: f32[128,8], index: 0, kind: input, shape index: {}]   ;;  %s1898_s1 = inlined_call_operand.hbm [shape: f32[8,128], index: 1, kind: input, shape index: {}]   ;;  %s1899_s2 = inlined_call_operand.hbm [shape: f32[1,128], index: 2, kind: input, shape index: {}]   ;;  %s1900_s3 = inlined_call_operand.hbm [shape: bf16[128,128], index: 3, kind: output, shape index: {}]  }
   0x1   :  { %9 = vsyncpa [#allocation6], 0 }
   0x2   :  { %10 = vsyncpa [#allocation4], 0  ;;  %s1227_s12 = smov [#allocation5]   ;;  %s1228_s14 = smov [#allocation2]  }
   0x3   :  { %s29_s13 = sshll.u32 %s1227_s12, 4  ;;  %s16_s15 = sshll.u32 %s1228_s14, 4  ;;  %s30_s13 = int_to_ptr.vmem [resolvable:$true] %s29_s13  ;;  %s1263_s15 = int_to_ptr.vmem [resolvable:$true] %s16_s15 }
   0x4   :  { %s1133_s18 = scalar_lea.hbm %s1898_s1, 128 }
   0x5   :  { %p1134_p0 = scmp.ne.s32.totalorder %s1898_s1, %s1133_s18  ;;  %p1137_p1 = scmp.lt.u32.totalorder %s1133_s18, %s1898_s1 }
   0x7   :  { %p1139_p2 = pnand %p1137_p1, %p1134_p0 }
   0x9   :  { %1142 = shalt.err (!%p1139_p2)
}
   0xa   :  { %s1143_s23 = scalar_lea.vmem %s30_s13, 128  ;;  %p1148_p4 = scmp.lt.s32.totalorder %s30_s13, %s30_s13 }
   0xb   :  { %p1144_p3 = scmp.ne.s32.totalorder %s30_s13, %s1143_s23  ;;  %p1149_p5 = scmp.lt.s32.totalorder %s1143_s23, %s1143_s23 }
   0xd   :  { %p1150_p6 = por %p1149_p5, %p1148_p4 }
   0xf   :  { %p1151_p7 = pnand %p1150_p6, %p1144_p3 }
  0x11   :  { %1154 = shalt.err (!%p1151_p7)
}
  0x12   :  { %32 = dma.hbm_to_vmem [thread:$0]  %s1898_s1, 128, %s30_s13, [#allocation6]  }
  0x13   :  { %s1155_s28 = scalar_lea.hbm %s1897_s0, 2048 }
  0x14   :  { %p1156_p8 = scmp.ne.s32.totalorder %s1897_s0, %s1155_s28  ;;  %p1159_p9 = scmp.lt.u32.totalorder %s1155_s28, %s1897_s0 }
  0x16   :  { %p1161_p10 = pnand %p1159_p9, %p1156_p8 }
  0x18   :  { %1164 = shalt.err (!%p1161_p10)
}
  0x19   :  { %s1165_s6 = scalar_lea.vmem %s1263_s15, 2048  ;;  %p1170_p12 = scmp.lt.s32.totalorder %s1263_s15, %s1263_s15 }
  0x1a   :  { %p1166_p11 = scmp.ne.s32.totalorder %s1263_s15, %s1165_s6  ;;  %p1171_p13 = scmp.lt.s32.totalorder %s1165_s6, %s1165_s6 }
  0x1c   :  { %p1172_p0 = por %p1171_p13, %p1170_p12 }
  0x1e   :  { %p1173_p1 = pnand %p1172_p0, %p1166_p11 }
  0x20   :  { %1176 = shalt.err (!%p1173_p1)
}
  0x21   :  { %s1229_s1 = smov 128   ;;  %s1230_s7 = smov 8  }
  0x22   :  { %22 = dma.hbm_to_vmem [thread:$0]  %s1897_s0, 2048, %s1263_s15, [#allocation3], %s1229_s1, %s1229_s1, %s1230_s7  }
  0x23   :  { %s1231_s10 = smov [#allocation7]   ;;  %s1177_s14 = scalar_lea.hbm %s1899_s2, 16 }
  0x24   :  { %s39_s11 = sshll.u32 %s1231_s10, 4  ;;  %p1178_p2 = scmp.ne.s32.totalorder %s1899_s2, %s1177_s14  ;;  %s40_s11 = int_to_ptr.vmem [resolvable:$true] %s39_s11 }
  0x25   :  { %p1181_p3 = scmp.lt.u32.totalorder %s1177_s14, %s1899_s2 }
  0x27   :  { %p1183_p4 = pnand %p1181_p3, %p1178_p2 }
  0x29   :  { %1186 = shalt.err (!%p1183_p4)
}
  0x2a   :  { %s1187_s20 = scalar_lea.vmem %s40_s11, 16  ;;  %s1191_s0 = scalar_lea.vmem %s40_s11, 32 }
  0x2b   :  { %p1188_p5 = scmp.ne.s32.totalorder %s40_s11, %s1187_s20  ;;  %p1192_p6 = scmp.lt.s32.totalorder %s40_s11, %s40_s11 }
  0x2c   :  { %p1193_p7 = scmp.lt.s32.totalorder %s1191_s0, %s1187_s20 }
  0x2e   :  { %p1194_p8 = por %p1193_p7, %p1192_p6 }
  0x30   :  { %p1195_p9 = pnand %p1194_p8, %p1188_p5 }
  0x32   :  { %1198 = shalt.err (!%p1195_p9)
}
  0x33   :  { %42 = dma.hbm_to_vmem [thread:$0]  %s1899_s2, 16, %s40_s11, [#allocation6]  }
  0x34   :  { %1221 = dma.done.wait [#allocation3], 2048  }
  0x35   :  { %1222 = vsyncadd [#allocation3], 4294965248 }
  0x36   :  { %1223 = dma.done.wait [#allocation6], 144  }
  0x37   :  { %1224 = vsyncadd [#allocation6], 4294967152  ;;  %v1232_v0 = vmov 0   ;;  %v1306_v1 = vld [vmem:[#allocation2 + $0x10] sm:$0xff]  ;;  %v1308_v2 = vld [vmem:[#allocation2] sm:$0xff]  ;;  %v1233_v17 = vmov 1  }
  0x38   :  { %1118 = vset.pattern.permute.xlu1 %v1232_v0  ;;  %1117 = vset.pattern.permute.xlu0 %v1232_v0  ;;  %v1312_v3 = vld [vmem:[#allocation2 + $0x18] sm:$0xff]  ;;  %v1314_v4 = vld [vmem:[#allocation2 + $0x8] sm:$0xff]  ;;  %v1320_v6 = vld [vmem:[#allocation2 + $0x20] sm:$0xff]  ;;  %v1234_v18 = vmov 2   ;;  %v1235_v19 = vmov 3   ;;  %v1236_v21 = vmov 4  }
  0x39   :  { %81 = vperm.xlu1 %1118, %v1306_v1   ;;  %71 = vperm.xlu0 %1117, %v1308_v2   ;;  %v1318_v5 = vld [vmem:[#allocation2 + $0x28] sm:$0xff]  ;;  %v1324_v7 = vld [vmem:[#allocation2 + $0x38] sm:$0xff]  ;;  %v1326_v8 = vld [vmem:[#allocation2 + $0x30] sm:$0xff]  ;;  %v1237_v37 = vmov 5   ;;  %v1238_v54 = vmov 6   ;;  %s1240_s2 = smov [#allocation8]  }
  0x3a   :  { %v1330_v9 = vld [vmem:[#allocation2 + $0x48] sm:$0xff]  ;;  %v1332_v10 = vld [vmem:[#allocation2 + $0x40] sm:$0xff]  ;;  %v1336_v11 = vld [vmem:[#allocation2 + $0x58] sm:$0xff]  ;;  %s1000_s22 = sshll.u32 %s1240_s2, 4  ;;  %s1001_s22 = int_to_ptr.vmem [resolvable:$true] %s1000_s22 }
  0x3b   :  { %1904 = vst [vmem:[#allocation12_spill] sm:$0xff] %v1332_v10  ;;  %v1338_v12 = vld [vmem:[#allocation2 + $0x50] sm:$0xff]  ;;  %v1342_v13 = vld [vmem:[#allocation2 + $0x68] sm:$0xff]  ;;  %v1344_v14 = vld [vmem:[#allocation2 + $0x60] sm:$0xff]  ;;  %s1199_s23 = scalar_lea.vmem %s1001_s22, 1024  ;;  %p1204_p11 = scmp.lt.s32.totalorder %s1001_s22, %s1001_s22 }
  0x3c   :  { %1905 = vst [vmem:[#allocation13_spill] sm:$0xff] %v1338_v12  ;;  %1906 = vst [vmem:[#allocation14_spill] sm:$0xff] %v1344_v14  ;;  %v1348_v15 = vld [vmem:[#allocation2 + $0x78] sm:$0xff]  ;;  %v1350_v16 = vld [vmem:[#allocation2 + $0x70] sm:$0xff]  ;;  %p1200_p10 = scmp.ne.s32.totalorder %s1001_s22, %s1199_s23  ;;  %p1205_p12 = scmp.lt.s32.totalorder %s1199_s23, %s1199_s23 }
  0x3d   :  { %86 = vperm.xlu1 %1118, %v1312_v3   ;;  %76 = vperm.xlu0 %1117, %v1314_v4   ;;  %v1506_v63 = vld [vmem:[#allocation5 + $0x1] ss:$0 sm:$0xff] }
  0x3e   :  { %p1206_p13 = por %p1205_p12, %p1204_p11 }
  0x40   :  { %p1207_p0 = pnand %p1206_p13, %p1200_p10 }
  0x41   :  { %96 = vperm.xlu1 %1118, %v1318_v5   ;;  %91 = vperm.xlu0 %1117, %v1320_v6  }
  0x45   :  { %106 = vperm.xlu1 %1118, %v1324_v7   ;;  %101 = vperm.xlu0 %1117, %v1326_v8  }
  0x49   :  { %116 = vperm.xlu1 %1118, %v1330_v9   ;;  %111 = vperm.xlu0 %1117, %v1332_v10  }
  0x4d   :  { %126 = vperm.xlu1 %1118, %v1336_v11   ;;  %121 = vperm.xlu0 %1117, %v1338_v12  }
  0x51   :  { %136 = vperm.xlu1 %1118, %v1342_v13   ;;  %131 = vperm.xlu0 %1117, %v1344_v14  }
  0x55   :  { %146 = vperm.xlu1 %1118, %v1348_v15   ;;  %141 = vperm.xlu0 %1117, %v1350_v16  }
  0x59   :  { %1120 = vset.pattern.permute.xlu1 %v1233_v17  ;;  %1119 = vset.pattern.permute.xlu0 %v1233_v17 }
  0x5a   :  { %175 = vperm.xlu1 %1120, %v1314_v4   ;;  %171 = vperm.xlu0 %1119, %v1308_v2  }
  0x5e   :  { %179 = vperm.xlu1 %1120, %v1306_v1   ;;  %183 = vperm.xlu0 %1119, %v1312_v3  }
  0x62   :  { %187 = vperm.xlu1 %1120, %v1320_v6   ;;  %191 = vperm.xlu0 %1119, %v1318_v5  }
  0x66   :  { %195 = vperm.xlu1 %1120, %v1326_v8   ;;  %199 = vperm.xlu0 %1119, %v1324_v7  }
  0x6a   :  { %203 = vperm.xlu1 %1120, %v1332_v10   ;;  %207 = vperm.xlu0 %1119, %v1330_v9  }
  0x6e   :  { %211 = vperm.xlu1 %1120, %v1338_v12   ;;  %215 = vperm.xlu0 %1119, %v1336_v11  }
  0x72   :  { %219 = vperm.xlu1 %1120, %v1344_v14   ;;  %223 = vperm.xlu0 %1119, %v1342_v13  }
  0x76   :  { %227 = vperm.xlu1 %1120, %v1350_v16   ;;  %231 = vperm.xlu0 %1119, %v1348_v15  }
  0x7a   :  { %1121 = vset.pattern.permute.xlu1 %v1234_v18  ;;  %1122 = vset.pattern.permute.xlu0 %v1234_v18 }
  0x7b   :  { %272 = vperm.xlu1 %1121, %v1308_v2   ;;  %276 = vperm.xlu0 %1122, %v1314_v4  }
  0x7f   :  { %280 = vperm.xlu1 %1121, %v1306_v1   ;;  %288 = vperm.xlu0 %1122, %v1320_v6  }
  0x83   :  { %284 = vperm.xlu1 %1121, %v1312_v3   ;;  %296 = vperm.xlu0 %1122, %v1326_v8  }
  0x87   :  { %292 = vperm.xlu1 %1121, %v1318_v5   ;;  %304 = vperm.xlu0 %1122, %v1332_v10  }
  0x8b   :  { %300 = vperm.xlu1 %1121, %v1324_v7   ;;  %312 = vperm.xlu0 %1122, %v1338_v12  }
  0x8f   :  { %308 = vperm.xlu1 %1121, %v1330_v9   ;;  %320 = vperm.xlu0 %1122, %v1344_v14  }
  0x93   :  { %316 = vperm.xlu1 %1121, %v1336_v11   ;;  %328 = vperm.xlu0 %1122, %v1350_v16  }
  0x97   :  { %324 = vperm.xlu1 %1121, %v1342_v13   ;;  %1123 = vset.pattern.permute.xlu0 %v1235_v19 }
  0x98   :  { %373 = vperm.xlu0 %1123, %v1308_v2  }
  0x9b   :  { %332 = vperm.xlu1 %1121, %v1348_v15  }
  0x9c   :  { %385 = vperm.xlu0 %1123, %v1312_v3  }
  0x9f   :  { %1124 = vset.pattern.permute.xlu1 %v1235_v19  ;;  %v1515_v19 = vld [vmem:[#allocation5] ss:$0 sm:$0xff] }
  0xa0   :  { %377 = vperm.xlu1 %1124, %v1314_v4   ;;  %393 = vperm.xlu0 %1123, %v1318_v5  }
  0xa4   :  { %381 = vperm.xlu1 %1124, %v1306_v1   ;;  %401 = vperm.xlu0 %1123, %v1324_v7  }
  0xa8   :  { %389 = vperm.xlu1 %1124, %v1320_v6   ;;  %409 = vperm.xlu0 %1123, %v1330_v9  }
  0xac   :  { %397 = vperm.xlu1 %1124, %v1326_v8   ;;  %417 = vperm.xlu0 %1123, %v1336_v11  }
  0xb0   :  { %405 = vperm.xlu1 %1124, %v1332_v10   ;;  %425 = vperm.xlu0 %1123, %v1342_v13  }
  0xb4   :  { %413 = vperm.xlu1 %1124, %v1338_v12   ;;  %433 = vperm.xlu0 %1123, %v1348_v15  }
  0xb8   :  { %v1400_v20 = vpop.permute.xlu1 %81  ;;  %421 = vperm.xlu1 %1124, %v1344_v14   ;;  %1126 = vset.pattern.permute.xlu0 %v1236_v21  ;;  %v1403_v22 = vpop.permute.xlu0 %71 }
  0xb9   :  { %1907 = vst [vmem:[#allocation15_spill] sm:$0xff] %v1400_v20  ;;  %1908 = vst [vmem:[#allocation16_spill] sm:$0xff] %v1403_v22  ;;  %478 = vperm.xlu0 %1126, %v1314_v4  }
  0xbc   :  { %v1406_v23 = vpop.permute.xlu1 %86  ;;  %429 = vperm.xlu1 %1124, %v1350_v16   ;;  %v1409_v24 = vpop.permute.xlu0 %76 }
  0xbd   :  { %490 = vperm.xlu0 %1126, %v1320_v6  }
  0xc0   :  { %v1412_v25 = vpop.permute.xlu1 %96  ;;  %1125 = vset.pattern.permute.xlu1 %v1236_v21  ;;  %v1414_v26 = vpop.permute.xlu0 %91 }
  0xc1   :  { %474 = vperm.xlu1 %1125, %v1308_v2   ;;  %498 = vperm.xlu0 %1126, %v1326_v8  }
  0xc4   :  { %v1418_v27 = vpop.permute.xlu1 %106  ;;  %v1420_v28 = vpop.permute.xlu0 %101 }
  0xc5   :  { %482 = vperm.xlu1 %1125, %v1306_v1   ;;  %506 = vperm.xlu0 %1126, %v1332_v10  }
  0xc8   :  { %v1424_v29 = vpop.permute.xlu1 %116  ;;  %v1426_v30 = vpop.permute.xlu0 %111 }
  0xc9   :  { %486 = vperm.xlu1 %1125, %v1312_v3   ;;  %514 = vperm.xlu0 %1126, %v1338_v12   ;;  %v162_v21 = vmul.f32 %v1515_v19, %v1424_v29 }
  0xcc   :  { %v1430_v31 = vpop.permute.xlu1 %126  ;;  %v1432_v32 = vpop.permute.xlu0 %121 }
  0xcd   :  { %494 = vperm.xlu1 %1125, %v1318_v5   ;;  %522 = vperm.xlu0 %1126, %v1344_v14  }
  0xd0   :  { %v1436_v33 = vpop.permute.xlu1 %136  ;;  %v1438_v34 = vpop.permute.xlu0 %131 }
  0xd1   :  { %502 = vperm.xlu1 %1125, %v1324_v7   ;;  %530 = vperm.xlu0 %1126, %v1350_v16  }
  0xd4   :  { %v1442_v35 = vpop.permute.xlu1 %146  ;;  %v1444_v36 = vpop.permute.xlu0 %141 }
  0xd5   :  { %510 = vperm.xlu1 %1125, %v1330_v9   ;;  %1127 = vset.pattern.permute.xlu0 %v1237_v37 }
  0xd6   :  { %575 = vperm.xlu0 %1127, %v1308_v2  }
  0xd9   :  { %v1448_v38 = vpop.permute.xlu1 %175  ;;  %518 = vperm.xlu1 %1125, %v1336_v11   ;;  %v1451_v39 = vpop.permute.xlu0 %171 }
  0xda   :  { %587 = vperm.xlu0 %1127, %v1312_v3  }
  0xdd   :  { %v1454_v40 = vpop.permute.xlu1 %179  ;;  %526 = vperm.xlu1 %1125, %v1342_v13   ;;  %v1457_v41 = vpop.permute.xlu0 %183 }
  0xde   :  { %1909 = vst [vmem:[#allocation17_spill] sm:$0xff] %v1454_v40  ;;  %595 = vperm.xlu0 %1127, %v1318_v5  }
  0xe1   :  { %v1460_v42 = vpop.permute.xlu1 %187  ;;  %534 = vperm.xlu1 %1125, %v1348_v15   ;;  %v1463_v43 = vpop.permute.xlu0 %191 }
  0xe2   :  { %603 = vperm.xlu0 %1127, %v1324_v7  }
  0xe5   :  { %v1466_v44 = vpop.permute.xlu1 %195  ;;  %1128 = vset.pattern.permute.xlu1 %v1237_v37  ;;  %v1468_v45 = vpop.permute.xlu0 %199  ;;  %v1519_v37 = vld [vmem:[#allocation5 + $0x2] ss:$0 sm:$0xff] }
  0xe6   :  { %579 = vperm.xlu1 %1128, %v1314_v4   ;;  %611 = vperm.xlu0 %1127, %v1330_v9  }
  0xe9   :  { %v1472_v46 = vpop.permute.xlu1 %203  ;;  %v208_v47 = vpop.permute.xlu0 %207 }
  0xea   :  { %583 = vperm.xlu1 %1128, %v1306_v1   ;;  %619 = vperm.xlu0 %1127, %v1336_v11   ;;  %v247_v18 = vmul.f32 %v1506_v63, %v208_v47  ;;  %v164_v47 = vmul.f32 %v1515_v19, %v1430_v31  ;;  %v166_v31 = vmul.f32 %v1515_v19, %v1436_v33 }
  0xed   :  { %v1476_v48 = vpop.permute.xlu1 %211  ;;  %v216_v49 = vpop.permute.xlu0 %215 }
  0xee   :  { %591 = vperm.xlu1 %1128, %v1320_v6   ;;  %627 = vperm.xlu0 %1127, %v1342_v13   ;;  %v249_v20 = vmul.f32 %v1506_v63, %v216_v49  ;;  %v1239_v49 = vmov 7  }
  0xf1   :  { %v1480_v50 = vpop.permute.xlu1 %219  ;;  %v224_v51 = vpop.permute.xlu0 %223 }
  0xf2   :  { %599 = vperm.xlu1 %1128, %v1326_v8   ;;  %635 = vperm.xlu0 %1127, %v1348_v15   ;;  %v251_v22 = vmul.f32 %v1506_v63, %v224_v51 }
  0xf5   :  { %v1484_v52 = vpop.permute.xlu1 %227  ;;  %v232_v53 = vpop.permute.xlu0 %231 }
  0xf6   :  { %607 = vperm.xlu1 %1128, %v1332_v10   ;;  %1130 = vset.pattern.permute.xlu0 %v1238_v54  ;;  %v253_v51 = vmul.f32 %v1506_v63, %v232_v53 }
  0xf7   :  { %680 = vperm.xlu0 %1130, %v1314_v4  }
  0xfa   :  { %615 = vperm.xlu1 %1128, %v1338_v12   ;;  %v1489_v55 = vpop.permute.xlu1 %272  ;;  %v277_v56 = vpop.permute.xlu0 %276 }
  0xfb   :  { %1910 = vst [vmem:[#allocation18_spill] sm:$0xff] %v1489_v55  ;;  %692 = vperm.xlu0 %1130, %v1320_v6   ;;  %v265_v55 = vadd.f32 %v249_v20, %v164_v47 }
  0xfe   :  { %623 = vperm.xlu1 %1128, %v1344_v14   ;;  %v1493_v57 = vpop.permute.xlu1 %280  ;;  %v1495_v58 = vpop.permute.xlu0 %288 }
  0xff   :  { %1911 = vst [vmem:[#allocation19_spill] sm:$0xff] %v1493_v57  ;;  %700 = vperm.xlu0 %1130, %v1326_v8   ;;  %v263_v57 = vadd.f32 %v247_v18, %v162_v21  ;;  %v267_v21 = vadd.f32 %v251_v22, %v166_v31  ;;  %v239_v22 = vmul.f32 %v1506_v63, %v1448_v38 }
 0x102   :  { %631 = vperm.xlu1 %1128, %v1350_v16   ;;  %v285_v59 = vpop.permute.xlu1 %284  ;;  %v1499_v60 = vpop.permute.xlu0 %296 }
 0x103   :  { %708 = vperm.xlu0 %1130, %v1332_v10   ;;  %v342_v33 = vmul.f32 %v1519_v37, %v285_v59  ;;  %v340_v59 = vmul.f32 %v1519_v37, %v277_v56 }
 0x106   :  { %1129 = vset.pattern.permute.xlu1 %v1238_v54  ;;  %v293_v61 = vpop.permute.xlu1 %292  ;;  %v1502_v62 = vpop.permute.xlu0 %304 }
 0x107   :  { %676 = vperm.xlu1 %1129, %v1308_v2   ;;  %716 = vperm.xlu0 %1130, %v1338_v12  }
 0x10a   :  { %v1508_v0 = vpop.permute.xlu1 %300  ;;  %v1510_v17 = vpop.permute.xlu0 %312 }
 0x10b   :  { %684 = vperm.xlu1 %1129, %v1306_v1   ;;  %724 = vperm.xlu0 %1130, %v1344_v14  }
 0x10e   :  { %v309_v54 = vpop.permute.xlu1 %308  ;;  %v1521_v12 = vpop.permute.xlu0 %320 }
 0x10f   :  { %v348_v10 = vmul.f32 %v1519_v37, %v309_v54  ;;  %688 = vperm.xlu1 %1129, %v1312_v3   ;;  %732 = vperm.xlu0 %1130, %v1350_v16  }
 0x111   :  { %v1529_v14 = vadd.f32 %v348_v10, %v263_v57  ;;  %v241_v57 = vmul.f32 %v1506_v63, %v1457_v41  ;;  %v168_v41 = vmul.f32 %v1515_v19, %v1442_v35 }
 0x112   :  { %v317_v29 = vpop.permute.xlu1 %316  ;;  %v1531_v40 = vpop.permute.xlu0 %328 }
 0x113   :  { %v350_v18 = vmul.f32 %v1519_v37, %v317_v29  ;;  %696 = vperm.xlu1 %1129, %v1318_v5   ;;  %1131 = vset.pattern.permute.xlu0 %v1239_v49  ;;  %v243_v29 = vmul.f32 %v1506_v63, %v1463_v43  ;;  %v269_v31 = vadd.f32 %v253_v51, %v168_v41 }
 0x114   :  { %777 = vperm.xlu0 %1131, %v1308_v2   ;;  %v156_v2 = vmul.f32 %v1515_v19, %v1406_v23  ;;  %v154_v23 = vmul.f32 %v1515_v19, %v1409_v24  ;;  %v344_v43 = vmul.f32 %v1519_v37, %v293_v61  ;;  %v160_v41 = vmul.f32 %v1515_v19, %v1418_v27 }
 0x115   :  { %v1540_v10 = vadd.f32 %v350_v18, %v265_v55 }
 0x116   :  { %v325_v20 = vpop.permute.xlu1 %324  ;;  %v257_v55 = vadd.f32 %v241_v57, %v156_v2  ;;  %v158_v57 = vmul.f32 %v1515_v19, %v1412_v25  ;;  %v255_v24 = vadd.f32 %v239_v22, %v154_v23 }
 0x117   :  { %v352_v54 = vmul.f32 %v1519_v37, %v325_v20  ;;  %704 = vperm.xlu1 %1129, %v1324_v7   ;;  %v1547_v47 = vpop.permute.xlu0 %373 }
 0x118   :  { %789 = vperm.xlu0 %1131, %v1312_v3   ;;  %v1564_v3 = vld [vmem:[#allocation5 + $0x3] ss:$0 sm:$0xff]  ;;  %v358_v20 = vadd.f32 %v342_v33, %v257_v55  ;;  %v259_v56 = vadd.f32 %v243_v29, %v158_v57  ;;  %v356_v25 = vadd.f32 %v340_v59, %v255_v24  ;;  %v244_v57 = vmul.f32 %v1506_v63, %v1466_v44 }
 0x119   :  { %v1557_v53 = vadd.f32 %v352_v54, %v267_v21  ;;  %v245_v54 = vmul.f32 %v1506_v63, %v1468_v45  ;;  %v242_v45 = vmul.f32 %v1506_v63, %v1460_v42  ;;  %v246_v44 = vmul.f32 %v1506_v63, %v1472_v46 }
 0x11a   :  { %v333_v18 = vpop.permute.xlu1 %332  ;;  %v360_v55 = vadd.f32 %v344_v43, %v259_v56  ;;  %v159_v43 = vmul.f32 %v1515_v19, %v1420_v28 }
 0x11b   :  { %v354_v35 = vmul.f32 %v1519_v37, %v333_v18  ;;  %712 = vperm.xlu1 %1129, %v1330_v9   ;;  %v386_v38 = vpop.permute.xlu0 %385  ;;  %v261_v18 = vadd.f32 %v245_v54, %v160_v41 }
 0x11c   :  { %v443_v21 = vmul.f32 %v1564_v3, %v386_v38  ;;  %797 = vperm.xlu0 %1131, %v1318_v5   ;;  %v346_v5 = vmul.f32 %v1519_v37, %v1508_v0  ;;  %v157_v0 = vmul.f32 %v1515_v19, %v1414_v26  ;;  %v260_v54 = vadd.f32 %v244_v57, %v159_v43 }
 0x11d   :  { %v1573_v51 = vadd.f32 %v354_v35, %v269_v31  ;;  %v343_v35 = vmul.f32 %v1519_v37, %v1495_v58  ;;  %v345_v58 = vmul.f32 %v1519_v37, %v1499_v60  ;;  %v347_v60 = vmul.f32 %v1519_v37, %v1502_v62 }
 0x11e   :  { %v1577_v2 = vadd.f32 %v443_v21, %v358_v20  ;;  %v258_v42 = vadd.f32 %v242_v45, %v157_v0  ;;  %v165_v0 = vmul.f32 %v1515_v19, %v1438_v34  ;;  %v1662_v34 = vld [vmem:[#allocation5 + $0x4] ss:$0 sm:$0xff] }
 0x11f   :  { %720 = vperm.xlu1 %1129, %v1336_v11   ;;  %v378_v61 = vpop.permute.xlu1 %377  ;;  %v394_v33 = vpop.permute.xlu0 %393 }
 0x120   :  { %v441_v22 = vmul.f32 %v1564_v3, %v378_v61  ;;  %v445_v29 = vmul.f32 %v1564_v3, %v394_v33  ;;  %805 = vperm.xlu0 %1131, %v1324_v7   ;;  %v362_v7 = vadd.f32 %v346_v5, %v261_v18  ;;  %v359_v24 = vadd.f32 %v343_v35, %v258_v42 }
 0x122   :  { %v1589_v27 = vadd.f32 %v441_v22, %v356_v25  ;;  %v1591_v23 = vadd.f32 %v445_v29, %v360_v55  ;;  %v161_v25 = vmul.f32 %v1515_v19, %v1426_v30  ;;  %v248_v30 = vmul.f32 %v1506_v63, %v1476_v48 }
 0x123   :  { %728 = vperm.xlu1 %1129, %v1342_v13   ;;  %v1594_v31 = vpop.permute.xlu1 %381  ;;  %v402_v59 = vpop.permute.xlu0 %401 }
 0x124   :  { %v447_v38 = vmul.f32 %v1564_v3, %v402_v59  ;;  %813 = vperm.xlu0 %1131, %v1330_v9  }
 0x126   :  { %v1604_v20 = vadd.f32 %v447_v38, %v362_v7  ;;  %v351_v38 = vmul.f32 %v1519_v37, %v1521_v12  ;;  %v167_v12 = vmul.f32 %v1515_v19, %v1444_v36  ;;  %v1913_v36 = vld [vmem:[#allocation18_spill] sm:$0xff] }
 0x127   :  { %736 = vperm.xlu1 %1129, %v1348_v15   ;;  %v390_v26 = vpop.permute.xlu1 %389  ;;  %v410_v21 = vpop.permute.xlu0 %409 }
 0x128   :  { %v444_v56 = vmul.f32 %v1564_v3, %v390_v26  ;;  %v449_v9 = vmul.f32 %v1564_v3, %v410_v21  ;;  %821 = vperm.xlu0 %1131, %v1336_v11   ;;  %v361_v11 = vadd.f32 %v345_v58, %v260_v54  ;;  %v353_v21 = vmul.f32 %v1519_v37, %v1531_v40 }
 0x129   :  { %v339_v54 = vmul.f32 %v1519_v37, %v1913_v36 }
 0x12a   :  { %v1616_v41 = vadd.f32 %v444_v56, %v359_v24  ;;  %v1619_v28 = vadd.f32 %v449_v9, %v1529_v14  ;;  %v262_v14 = vadd.f32 %v246_v44, %v161_v25  ;;  %v1912_v9 = vld [vmem:[#allocation16_spill] sm:$0xff] }
 0x12b   :  { %1132 = vset.pattern.permute.xlu1 %v1239_v49  ;;  %v398_v61 = vpop.permute.xlu1 %397  ;;  %v418_v33 = vpop.permute.xlu0 %417  ;;  %v163_v49 = vmul.f32 %v1515_v19, %v1432_v32  ;;  %v153_v44 = vmul.f32 %v1515_v19, %v1912_v9 }
 0x12c   :  { %v446_v55 = vmul.f32 %v1564_v3, %v398_v61  ;;  %v451_v46 = vmul.f32 %v1564_v3, %v418_v33  ;;  %781 = vperm.xlu1 %1132, %v1314_v4   ;;  %829 = vperm.xlu0 %1131, %v1342_v13   ;;  %v363_v22 = vadd.f32 %v347_v60, %v262_v14  ;;  %v1914_v60 = vld [vmem:[#allocation17_spill] sm:$0xff]  ;;  %v1915_v33 = vld [vmem:[#allocation12_spill] sm:$0xff] }
 0x12d   :  { %v349_v4 = vmul.f32 %v1519_v37, %v1510_v17  ;;  %v264_v48 = vadd.f32 %v248_v30, %v163_v49  ;;  %v1916_v30 = vld [vmem:[#allocation15_spill] sm:$0xff] }
 0x12e   :  { %v1632_v5 = vadd.f32 %v446_v55, %v361_v11  ;;  %v1635_v62 = vadd.f32 %v451_v46, %v1540_v10  ;;  %v250_v10 = vmul.f32 %v1506_v63, %v1480_v50  ;;  %v440_v46 = vmul.f32 %v1564_v3, %v1547_v47 }
 0x12f   :  { %v406_v29 = vpop.permute.xlu1 %405  ;;  %v426_v45 = vpop.permute.xlu0 %425  ;;  %v365_v7 = vadd.f32 %v349_v4, %v264_v48  ;;  %v442_v47 = vmul.f32 %v1564_v3, %v1594_v31 }
 0x130   :  { %v448_v13 = vmul.f32 %v1564_v3, %v406_v29  ;;  %v453_v18 = vmul.f32 %v1564_v3, %v426_v45  ;;  %785 = vperm.xlu1 %1132, %v1306_v1   ;;  %837 = vperm.xlu0 %1131, %v1348_v15   ;;  %v266_v50 = vadd.f32 %v250_v10, %v165_v0  ;;  %v1917_v29 = vld [vmem:[#allocation19_spill] sm:$0xff] }
 0x132   :  { %v464_v59 = vadd.f32 %v448_v13, %v363_v22  ;;  %v1648_v32 = vadd.f32 %v453_v18, %v1557_v53  ;;  %v252_v53 = vmul.f32 %v1506_v63, %v1484_v52  ;;  %v367_v26 = vadd.f32 %v351_v38, %v266_v50  ;;  %v1918_v13 = vld [vmem:[#allocation13_spill] sm:$0xff] }
 0x133   :  { %v414_v17 = vpop.permute.xlu1 %413  ;;  %v434_v35 = vpop.permute.xlu0 %433  ;;  %v238_v52 = vmul.f32 %v1506_v63, %v1451_v39 }
 0x134   :  { %v450_v1 = vmul.f32 %v1564_v3, %v414_v17  ;;  %v455_v15 = vmul.f32 %v1564_v3, %v434_v35  ;;  %793 = vperm.xlu1 %1132, %v1320_v6   ;;  %v268_v58 = vadd.f32 %v252_v53, %v167_v12 }
 0x135   :  { %v254_v55 = vadd.f32 %v238_v52, %v153_v44 }
 0x136   :  { %v466_v42 = vadd.f32 %v450_v1, %v365_v7  ;;  %v1660_v57 = vadd.f32 %v455_v15, %v1573_v51  ;;  %v369_v61 = vadd.f32 %v353_v21, %v268_v58 }
 0x137   :  { %v422_v43 = vpop.permute.xlu1 %421  ;;  %v355_v22 = vadd.f32 %v339_v54, %v254_v55 }
 0x138   :  { %v452_v6 = vmul.f32 %v1564_v3, %v422_v43  ;;  %801 = vperm.xlu1 %1132, %v1326_v8   ;;  %v479_v24 = vpop.permute.xlu0 %478  ;;  %v240_v8 = vmul.f32 %v1506_v63, %v1914_v60  ;;  %v341_v63 = vmul.f32 %v1519_v37, %v1917_v29 }
 0x139   :  { %v542_v51 = vmul.f32 %v1662_v34, %v479_v24  ;;  %v456_v10 = vadd.f32 %v440_v46, %v355_v22 }
 0x13a   :  { %v468_v56 = vadd.f32 %v452_v6, %v367_v26 }
 0x13b   :  { %v1678_v40 = vadd.f32 %v542_v51, %v1589_v27  ;;  %v430_v25 = vpop.permute.xlu1 %429  ;;  %v155_v27 = vmul.f32 %v1515_v19, %v1916_v30 }
 0x13c   :  { %v454_v39 = vmul.f32 %v1564_v3, %v430_v25  ;;  %809 = vperm.xlu1 %1132, %v1915_v33   ;;  %v491_v11 = vpop.permute.xlu0 %490 }
 0x13d   :  { %v545_v14 = vmul.f32 %v1662_v34, %v491_v11  ;;  %v256_v4 = vadd.f32 %v240_v8, %v155_v27  ;;  %v1741_v27 = vld [vmem:[#allocation5 + $0x5] ss:$0 sm:$0xff] }
 0x13e   :  { %v470_v49 = vadd.f32 %v454_v39, %v369_v61 }
 0x13f   :  { %v1692_v45 = vadd.f32 %v545_v14, %v1616_v41  ;;  %v357_v17 = vadd.f32 %v341_v63, %v256_v4  ;;  %v1919_v41 = vld [vmem:[#allocation14_spill] sm:$0xff] }
 0x140   :  { %817 = vperm.xlu1 %1132, %v1918_v13   ;;  %v475_v18 = vpop.permute.xlu1 %474  ;;  %v499_v48 = vpop.permute.xlu0 %498 }
 0x141   :  { %v541_v0 = vmul.f32 %v1662_v34, %v475_v18  ;;  %v547_v19 = vmul.f32 %v1662_v34, %v499_v48  ;;  %v458_v1 = vadd.f32 %v442_v47, %v357_v17 }
 0x143   :  { %v1699_v35 = vadd.f32 %v541_v0, %v456_v10  ;;  %v563_v37 = vadd.f32 %v547_v19, %v1632_v5 }
 0x144   :  { %825 = vperm.xlu1 %1132, %v1919_v41   ;;  %v483_v7 = vpop.permute.xlu1 %482  ;;  %v507_v38 = vpop.permute.xlu0 %506 }
 0x145   :  { %v543_v15 = vmul.f32 %v1662_v34, %v483_v7  ;;  %v549_v50 = vmul.f32 %v1662_v34, %v507_v38 }
 0x147   :  { %v559_v53 = vadd.f32 %v543_v15, %v458_v1  ;;  %v565_v3 = vadd.f32 %v549_v50, %v464_v59 }
 0x148   :  { %833 = vperm.xlu1 %1132, %v1350_v16   ;;  %v487_v31 = vpop.permute.xlu1 %486  ;;  %v515_v43 = vpop.permute.xlu0 %514 }
 0x149   :  { %v544_v12 = vmul.f32 %v1662_v34, %v487_v31  ;;  %v551_v26 = vmul.f32 %v1662_v34, %v515_v43 }
 0x14b   :  { %v1709_v5 = vadd.f32 %v544_v12, %v1577_v2  ;;  %v567_v21 = vadd.f32 %v551_v26, %v466_v42 }
 0x14c   :  { %v495_v6 = vpop.permute.xlu1 %494  ;;  %v523_v24 = vpop.permute.xlu0 %522 }
 0x14d   :  { %v546_v52 = vmul.f32 %v1662_v34, %v495_v6  ;;  %v553_v51 = vmul.f32 %v1662_v34, %v523_v24 }
 0x14f   :  { %v1714_v59 = vadd.f32 %v546_v52, %v1591_v23  ;;  %v569_v16 = vadd.f32 %v553_v51, %v468_v56 }
 0x150   :  { %v503_v58 = vpop.permute.xlu1 %502  ;;  %v531_v9 = vpop.permute.xlu0 %530 }
 0x151   :  { %v548_v44 = vmul.f32 %v1662_v34, %v503_v58  ;;  %v555_v36 = vmul.f32 %v1662_v34, %v531_v9 }
 0x153   :  { %v1719_v2 = vadd.f32 %v548_v44, %v1604_v20  ;;  %v571_v42 = vadd.f32 %v555_v36, %v470_v49 }
 0x154   :  { %v511_v54 = vpop.permute.xlu1 %510 }
 0x155   :  { %v550_v25 = vmul.f32 %v1662_v34, %v511_v54  ;;  %v576_v60 = vpop.permute.xlu0 %575 }
 0x157   :  { %v1723_v8 = vadd.f32 %v550_v25, %v1619_v28 }
 0x158   :  { %v519_v23 = vpop.permute.xlu1 %518 }
 0x159   :  { %v552_v56 = vmul.f32 %v1662_v34, %v519_v23  ;;  %v588_v61 = vpop.permute.xlu0 %587  ;;  %v642_v23 = vmul.f32 %v1741_v27, %v576_v60 }
 0x15b   :  { %v1727_v39 = vadd.f32 %v552_v56, %v1635_v62  ;;  %v1790_v56 = vld [vmem:[#allocation5 + $0x6] ss:$0 sm:$0xff] }
 0x15c   :  { %v527_v33 = vpop.permute.xlu1 %526 }
 0x15d   :  { %v554_v11 = vmul.f32 %v1662_v34, %v527_v33  ;;  %v1730_v20 = vpop.permute.xlu0 %595  ;;  %v1792_v33 = vld [vmem:[#allocation5 + $0x7] ss:$0 sm:$0xff] }
 0x15f   :  { %v1733_v55 = vadd.f32 %v554_v11, %v1648_v32 }
 0x160   :  { %v535_v46 = vpop.permute.xlu1 %534 }
 0x161   :  { %v556_v14 = vmul.f32 %v1662_v34, %v535_v46  ;;  %v1736_v28 = vpop.permute.xlu0 %603 }
 0x163   :  { %v1739_v30 = vadd.f32 %v556_v14, %v1660_v57  ;;  %v658_v14 = vadd.f32 %v642_v23, %v1699_v35  ;;  %v647_v35 = vmul.f32 %v1741_v27, %v1730_v20 }
 0x165   :  { %v580_v62 = vpop.permute.xlu1 %579  ;;  %v1743_v49 = vpop.permute.xlu0 %611  ;;  %v663_v20 = vadd.f32 %v647_v35, %v1714_v59 }
 0x166   :  { %v643_v22 = vmul.f32 %v1741_v27, %v580_v62  ;;  %v645_v62 = vmul.f32 %v1741_v27, %v588_v61  ;;  %v651_v59 = vmul.f32 %v1741_v27, %v1743_v49 }
 0x168   :  { %v1747_v29 = vadd.f32 %v643_v22, %v1678_v40 }
 0x169   :  { %v584_v32 = vpop.permute.xlu1 %583  ;;  %v1749_v63 = vpop.permute.xlu0 %619 }
 0x16a   :  { %v644_v34 = vmul.f32 %v1741_v27, %v584_v32 }
 0x16c   :  { %v1752_v4 = vadd.f32 %v644_v34, %v559_v53 }
 0x16d   :  { %v592_v13 = vpop.permute.xlu1 %591  ;;  %v1754_v57 = vpop.permute.xlu0 %627 }
 0x16e   :  { %v646_v18 = vmul.f32 %v1741_v27, %v592_v13 }
 0x170   :  { %v1758_v48 = vadd.f32 %v646_v18, %v1692_v45 }
 0x171   :  { %v600_v10 = vpop.permute.xlu1 %599  ;;  %v1760_v47 = vpop.permute.xlu0 %635 }
 0x172   :  { %v648_v40 = vmul.f32 %v1741_v27, %v600_v10  ;;  %v661_v10 = vadd.f32 %v645_v62, %v1709_v5  ;;  %v649_v5 = vmul.f32 %v1741_v27, %v1736_v28 }
 0x174   :  { %v1763_v0 = vadd.f32 %v648_v40, %v563_v37 }
 0x175   :  { %v608_v19 = vpop.permute.xlu1 %607 }
 0x176   :  { %v650_v17 = vmul.f32 %v1741_v27, %v608_v19  ;;  %v681_v41 = vpop.permute.xlu0 %680 }
 0x177   :  { %v744_v18 = vmul.f32 %v1790_v56, %v681_v41 }
 0x178   :  { %v1766_v7 = vadd.f32 %v650_v17, %v565_v3  ;;  %v1808_v17 = vld [vmem:[#allocation7] ss:$0 sm:$0xff] }
 0x179   :  { %v616_v38 = vpop.permute.xlu1 %615 }
 0x17a   :  { %v652_v1 = vmul.f32 %v1741_v27, %v616_v38  ;;  %v693_v15 = vpop.permute.xlu0 %692 }
 0x17c   :  { %v1769_v50 = vadd.f32 %v652_v1, %v567_v21 }
 0x17d   :  { %v624_v45 = vpop.permute.xlu1 %623 }
 0x17e   :  { %v654_v53 = vmul.f32 %v1741_v27, %v624_v45  ;;  %v1772_v31 = vpop.permute.xlu0 %700  ;;  %v760_v45 = vadd.f32 %v744_v18, %v1747_v29 }
 0x180   :  { %v1774_v43 = vadd.f32 %v654_v53, %v569_v16 }
 0x181   :  { %v632_v37 = vpop.permute.xlu1 %631 }
 0x182   :  { %v656_v12 = vmul.f32 %v1741_v27, %v632_v37  ;;  %v1777_v26 = vpop.permute.xlu0 %708 }
 0x184   :  { %v1779_v3 = vadd.f32 %v656_v12, %v571_v42 }
 0x186   :  { %v677_v6 = vpop.permute.xlu1 %676  ;;  %v1781_v24 = vpop.permute.xlu0 %716 }
 0x187   :  { %v743_v46 = vmul.f32 %v1790_v56, %v677_v6 }
 0x189   :  { %v759_v34 = vadd.f32 %v743_v46, %v658_v14  ;;  %v665_v14 = vadd.f32 %v649_v5, %v1719_v2 }
 0x18a   :  { %v685_v52 = vpop.permute.xlu1 %684  ;;  %v1783_v21 = vpop.permute.xlu0 %724 }
 0x18b   :  { %v745_v61 = vmul.f32 %v1790_v56, %v685_v52 }
 0x18d   :  { %v761_v29 = vadd.f32 %v745_v61, %v1752_v4  ;;  %v667_v61 = vadd.f32 %v651_v59, %v1723_v8  ;;  %v751_v8 = vmul.f32 %v1790_v56, %v1777_v26 }
 0x18e   :  { %v689_v51 = vpop.permute.xlu1 %688  ;;  %v1785_v58 = vpop.permute.xlu0 %732 }
 0x18f   :  { %v746_v60 = vmul.f32 %v1790_v56, %v689_v51 }
 0x191   :  { %v762_v38 = vadd.f32 %v746_v60, %v661_v10 }
 0x192   :  { %v697_v9 = vpop.permute.xlu1 %696 }
 0x193   :  { %v778_v44 = vpop.permute.xlu0 %777  ;;  %v748_v53 = vmul.f32 %v1790_v56, %v697_v9 }
 0x194   :  { %v844_v22 = vmul.f32 %v1792_v33, %v778_v44  ;;  %v747_v44 = vmul.f32 %v1790_v56, %v693_v15 }
 0x195   :  { %v764_v9 = vadd.f32 %v748_v53, %v663_v20 }
 0x196   :  { %v705_v16 = vpop.permute.xlu1 %704  ;;  %v860_v40 = vadd.f32 %v844_v22, %v759_v34  ;;  %v763_v60 = vadd.f32 %v747_v44, %v1758_v48 }
 0x197   :  { %v790_v54 = vpop.permute.xlu0 %789  ;;  %v750_v23 = vmul.f32 %v1790_v56, %v705_v16  ;;  %v749_v16 = vmul.f32 %v1790_v56, %v1772_v31 }
 0x198   :  { %v847_v19 = vmul.f32 %v1792_v33, %v790_v54  ;;  %v883_v37 = vadd.f32 %v1808_v17, %v860_v40 }
 0x199   :  { %v766_v40 = vadd.f32 %v750_v23, %v665_v14  ;;  %v765_v53 = vadd.f32 %v749_v16, %v1763_v0 }
 0x19a   :  { %v713_v36 = vpop.permute.xlu1 %712  ;;  %v863_v12 = vadd.f32 %v847_v19, %v762_v38  ;;  %v899_v62 = vmax.f32 %v883_v37, 0.0 }
 0x19b   :  { %v798_v42 = vpop.permute.xlu0 %797  ;;  %v752_v18 = vmul.f32 %v1790_v56, %v713_v36 }
 0x19c   :  { %v849_v51 = vmul.f32 %v1792_v33, %v798_v42  ;;  %v886_v42 = vadd.f32 %v1808_v17, %v863_v12 }
 0x19e   :  { %v1787_v25 = vpop.permute.xlu1 %720  ;;  %v865_v22 = vadd.f32 %v849_v51, %v764_v9  ;;  %v902_v38 = vmax.f32 %v886_v42, 0.0  ;;  %v655_v51 = vmul.f32 %v1741_v27, %v1754_v57  ;;  %v753_v9 = vmul.f32 %v1790_v56, %v1781_v24 }
 0x19f   :  { %v806_v13 = vpop.permute.xlu0 %805  ;;  %v754_v5 = vmul.f32 %v1790_v56, %v1787_v25  ;;  %v767_v57 = vadd.f32 %v751_v8, %v1766_v7  ;;  %v657_v42 = vmul.f32 %v1741_v27, %v1760_v47 }
 0x1a0   :  { %v851_v15 = vmul.f32 %v1792_v33, %v806_v13  ;;  %v653_v13 = vmul.f32 %v1741_v27, %v1749_v63  ;;  %v888_v31 = vadd.f32 %v1808_v17, %v865_v22  ;;  %v769_v7 = vadd.f32 %v753_v9, %v1769_v50 }
 0x1a2   :  { %v1794_v11 = vpop.permute.xlu1 %728  ;;  %v669_v20 = vadd.f32 %v653_v13, %v1727_v39 }
 0x1a3   :  { %v814_v6 = vpop.permute.xlu0 %813  ;;  %v756_v39 = vmul.f32 %v1790_v56, %v1794_v11 }
 0x1a4   :  { %v853_v48 = vmul.f32 %v1792_v33, %v814_v6  ;;  %v770_v23 = vadd.f32 %v754_v5, %v669_v20 }
 0x1a6   :  { %v1800_v32 = vpop.permute.xlu1 %736 }
 0x1a7   :  { %v822_v10 = vpop.permute.xlu0 %821  ;;  %v758_v27 = vmul.f32 %v1790_v56, %v1800_v32  ;;  %v757_v32 = vmul.f32 %v1790_v56, %v1785_v58 }
 0x1a8   :  { %v855_v0 = vmul.f32 %v1792_v33, %v822_v10 }
 0x1aa   :  { %v871_v24 = vadd.f32 %v855_v0, %v770_v23 }
 0x1ab   :  { %v782_v1 = vpop.permute.xlu1 %781  ;;  %v830_v44 = vpop.permute.xlu0 %829 }
 0x1ac   :  { %v845_v41 = vmul.f32 %v1792_v33, %v782_v1  ;;  %v867_v1 = vadd.f32 %v851_v15, %v766_v40  ;;  %v673_v40 = vadd.f32 %v657_v42, %v1739_v30 }
 0x1ae   :  { %v861_v52 = vadd.f32 %v845_v41, %v760_v45  ;;  %v768_v41 = vadd.f32 %v752_v18, %v667_v61  ;;  %v890_v25 = vadd.f32 %v1808_v17, %v867_v1 }
 0x1af   :  { %v786_v54 = vpop.permute.xlu1 %785  ;;  %v838_v18 = vpop.permute.xlu0 %837 }
 0x1b0   :  { %v884_v46 = vadd.f32 %v1808_v17, %v861_v52  ;;  %v846_v28 = vmul.f32 %v1792_v33, %v786_v54  ;;  %v869_v52 = vadd.f32 %v853_v48, %v768_v41  ;;  %v906_v15 = vmax.f32 %v890_v25, 0.0 }
 0x1b1   :  { %v774_v48 = vadd.f32 %v758_v27, %v673_v40 }
 0x1b2   :  { %v900_v4 = vmax.f32 %v884_v46, 0.0  ;;  %v862_v34 = vadd.f32 %v846_v28, %v761_v29  ;;  %v904_v29 = vmax.f32 %v888_v31, 0.0  ;;  %v892_v22 = vadd.f32 %v1808_v17, %v869_v52 }
 0x1b3   :  { %v794_v2 = vpop.permute.xlu1 %793 }
 0x1b4   :  { %v1057_v19 = vpack.c.bf16 %v900_v4, %v899_v62  ;;  %v885_v49 = vadd.f32 %v1808_v17, %v862_v34  ;;  %v848_v35 = vmul.f32 %v1792_v33, %v794_v2  ;;  %v671_v62 = vadd.f32 %v655_v51, %v1733_v55 }
 0x1b5   :  { %v857_v4 = vmul.f32 %v1792_v33, %v830_v44 }
 0x1b6   :  { %1058 = vst [vmem:[#allocation8] sm:$0xff] %v1057_v19   ;;  %v901_v36 = vmax.f32 %v885_v49, 0.0  ;;  %v864_v45 = vadd.f32 %v848_v35, %v763_v60  ;;  %v755_v60 = vmul.f32 %v1790_v56, %v1783_v21  ;;  %v772_v16 = vadd.f32 %v756_v39, %v671_v62 }
 0x1b7   :  { %v802_v37 = vpop.permute.xlu1 %801  ;;  %v908_v19 = vmax.f32 %v892_v22, 0.0  ;;  %v894_v49 = vadd.f32 %v1808_v17, %v871_v24  ;;  %v859_v35 = vmul.f32 %v1792_v33, %v838_v18 }
 0x1b8   :  { %v1062_v63 = vpack.c.bf16 %v902_v38, %v901_v36  ;;  %v887_v12 = vadd.f32 %v1808_v17, %v864_v45  ;;  %v850_v6 = vmul.f32 %v1792_v33, %v802_v37  ;;  %v873_v50 = vadd.f32 %v857_v4, %v772_v16 }
 0x1b9   :  { %v771_v13 = vadd.f32 %v755_v60, %v1774_v43  ;;  %v910_v36 = vmax.f32 %v894_v49, 0.0  ;;  %v773_v43 = vadd.f32 %v757_v32, %v1779_v3 }
 0x1ba   :  { %1094 = vst [vmem:[#allocation8 + $0x8] sm:$0xff] %v1062_v63   ;;  %v903_v54 = vmax.f32 %v887_v12, 0.0  ;;  %v866_v26 = vadd.f32 %v850_v6, %v765_v53  ;;  %v896_v45 = vadd.f32 %v1808_v17, %v873_v50  ;;  %v875_v53 = vadd.f32 %v859_v35, %v774_v48 }
 0x1bb   :  { %v810_v46 = vpop.permute.xlu1 %809 }
 0x1bc   :  { %v1067_v28 = vpack.c.bf16 %v904_v29, %v903_v54  ;;  %v889_v14 = vadd.f32 %v1808_v17, %v866_v26  ;;  %v852_v59 = vmul.f32 %v1792_v33, %v810_v46  ;;  %v912_v63 = vmax.f32 %v896_v45, 0.0 }
 0x1bd   :  { %v898_v12 = vadd.f32 %v1808_v17, %v875_v53 }
 0x1be   :  { %1095 = vst [vmem:[#allocation8 + $0x10] sm:$0xff] %v1067_v28   ;;  %v905_v11 = vmax.f32 %v889_v14, 0.0  ;;  %v868_v34 = vadd.f32 %v852_v59, %v767_v57 }
 0x1bf   :  { %v818_v55 = vpop.permute.xlu1 %817  ;;  %v914_v0 = vmax.f32 %v898_v12, 0.0 }
 0x1c0   :  { %v1072_v47 = vpack.c.bf16 %v906_v15, %v905_v11  ;;  %v891_v10 = vadd.f32 %v1808_v17, %v868_v34  ;;  %v854_v2 = vmul.f32 %v1792_v33, %v818_v55 }
 0x1c2   :  { %1096 = vst [vmem:[#allocation8 + $0x18] sm:$0xff] %v1072_v47   ;;  %v907_v21 = vmax.f32 %v891_v10, 0.0  ;;  %v870_v61 = vadd.f32 %v854_v2, %v769_v7 }
 0x1c3   :  { %v826_v38 = vpop.permute.xlu1 %825 }
 0x1c4   :  { %v1077_v31 = vpack.c.bf16 %v908_v19, %v907_v21  ;;  %v893_v1 = vadd.f32 %v1808_v17, %v870_v61  ;;  %v856_v30 = vmul.f32 %v1792_v33, %v826_v38 }
 0x1c6   :  { %1097 = vst [vmem:[#allocation8 + $0x20] sm:$0xff] %v1077_v31   ;;  %v909_v41 = vmax.f32 %v893_v1, 0.0  ;;  %v872_v5 = vadd.f32 %v856_v30, %v771_v13 }
 0x1c7   :  { %v834_v37 = vpop.permute.xlu1 %833 }
 0x1c8   :  { %v1082_v8 = vpack.c.bf16 %v910_v36, %v909_v41  ;;  %v895_v58 = vadd.f32 %v1808_v17, %v872_v5  ;;  %v858_v56 = vmul.f32 %v1792_v33, %v834_v37 }
 0x1ca   :  { %1098 = vst [vmem:[#allocation8 + $0x28] sm:$0xff] %v1082_v8   ;;  %v911_v6 = vmax.f32 %v895_v58, 0.0  ;;  %v874_v20 = vadd.f32 %v858_v56, %v773_v43 }
 0x1cc   :  { %v1087_v51 = vpack.c.bf16 %v912_v63, %v911_v6  ;;  %v897_v52 = vadd.f32 %v1808_v17, %v874_v20 }
 0x1ce   :  { %1099 = vst [vmem:[#allocation8 + $0x30] sm:$0xff] %v1087_v51   ;;  %v913_v44 = vmax.f32 %v897_v52, 0.0 }
 0x1d0   :  { %v1092_v3 = vpack.c.bf16 %v914_v0, %v913_v44 }
 0x1d2   :  { %1100 = vst [vmem:[#allocation8 + $0x38] sm:$0xff] %v1092_v3  }
 0x1d3   :  { %1210 = shalt.err (!%p1207_p0)
}
 0x1d4   :  { %s1211_s26 = scalar_lea.hbm %s1900_s3, 1024 }
 0x1d5   :  { %p1212_p1 = scmp.ne.s32.totalorder %s1900_s3, %s1211_s26  ;;  %p1215_p2 = scmp.lt.u32.totalorder %s1211_s26, %s1900_s3 }
 0x1d7   :  { %p1217_p3 = pnand %p1215_p2, %p1212_p1 }
 0x1d9   :  { %1220 = shalt.err (!%p1217_p3)
}
 0x1da   :  { %s1241_s4 = smov 64   ;;  %s1242_s5 = smov 4  }
 0x1db   :  { %1006 = dma.vmem_to_hbm [thread:$0]  %s1001_s22, 1024, %s1900_s3, [#allocation4], %s1241_s4, %s1241_s4, %s1242_s5  }
 0x1dc   :  { %1225 = dma.done.wait [#allocation4], 1024  }
 0x1dd   :  { %1226 = vsyncadd [#allocation4], 4294966272 }
 0x1de   :  { %1010 = vsyncpa [#allocation3], 1 }
 0x1df   :  { %1011 = vsyncpa [#allocation6], 1 }
 0x1e0   :  { %1012 = vsyncpa [#allocation4], 1 }

</bundles_post_ra>
